<compile_context>
chip_gen: v7x
topology: tpu7x:2x2x1
jax: 0.10.0
libtpu: 0.0.40
codegen_flags: <defaults>
</compile_context>

<pallas_src>
import numpy as np
import jax
import jax.numpy as jnp
from jax import lax
from jax.experimental import pallas as pl
from jax.experimental.pallas import tpu as pltpu

NEG_SLOPE = 0.01  # default negative_slope of nn.LeakyReLU
N_STAGES = 3


def _make_kernel(H, W, C, Nb):
    HW = H * W
    R = Nb * C  # rows per block: (sample, channel) folded onto sublanes

    # Static tap geometry: roll shift along the flattened per-plane lane axis.
    # out[p] = x[p + dy*W + dx]  ->  roll by (-(dy*W+dx)) mod HW, then mask border.
    taps = []
    for ky in range(3):
        for kx in range(3):
            dy, dx = ky - 1, kx - 1
            taps.append(((-(dy * W + dx)) % HW, dy == 0 and dx == 0))

    def kernel(x1_ref, x2_ref, w_ref, b_ref, m_ref, o_ref):
        # x1/x2/o blocks: (R, HW); w: (3, R, 9R); b: (3, R, HW); m: (9, R, HW)
        x = x1_ref[...].astype(jnp.float32) + x2_ref[...].astype(jnp.float32)

        for s in range(N_STAGES):
            wmat = w_ref[s]                                # (R, 9R), block-diag over samples
            tap_vals = []
            for t, (shift, is_center) in enumerate(taps):
                if is_center:
                    tap_vals.append(x)                     # no roll, no mask
                else:
                    # roll -> XLU slot; mask multiply -> VPU; mask already
                    # pre-broadcast and VMEM-resident (no broadcast_in_dim).
                    tap_vals.append(pltpu.roll(x, shift, axis=1) * m_ref[t])
            # Sublane-aligned stack of full (R, HW) pieces -> (9R, HW), no repacking.
            xstack = jnp.concatenate(tap_vals, axis=0)
            # One MXU matmul per stage replaces v1's per-(tap,cin) broadcast-MAC loop.
            y = jnp.dot(wmat, xstack, preferred_element_type=jnp.float32) + b_ref[s]
            x = jnp.where(y > 0, y, NEG_SLOPE * y)         # LeakyReLU

        o_ref[...] = x.astype(o_ref.dtype)

    return kernel


def _pick_nb(N, C, HW):
    """Samples per grid step: fill sublanes (Nb*C % 8 == 0); grow only while the
    grid keeps >= 4 steps (pipelining / megacore) and blocks stay small."""
    best = None
    for nb in (1, 2, 4, 8, 16):
        if N % nb != 0 or (nb * C) % 8 != 0:
            continue
        if best is None:
            best = nb
        elif N // nb >= 4 and nb * C * HW * 4 <= 512 * 1024:
            best = nb
    # Fallback: whole batch in one block (block dim == full array dim is legal).
    return best if best is not None else N


def _pack_params(params, Nb, H, W):
    """Host-side repack for the block-diagonal per-stage MXU matmul.

    Returns:
      w_all: (N_STAGES, R, 9*R) with W[nb*C+co, t*R + nb*C + ci] = w[ky,kx,ci,co]
      b_all: (N_STAGES, R, HW)  bias pre-broadcast over the lane (spatial) axis
    """
    HW = H * W
    C = params[0][0].shape[2]
    R = Nb * C
    w_all = np.zeros((N_STAGES, R, 9 * R), np.float32)
    b_all = np.zeros((N_STAGES, R, HW), np.float32)
    for s, (w, b) in enumerate(params):
        # HWIO (ky,kx,cin,cout) -> (tap, cout, cin)
        w_oc = np.transpose(np.asarray(w, np.float32), (0, 1, 3, 2)).reshape(9, C, C)
        b_np = np.asarray(b, np.float32)
        for t in range(9):
            for nb in range(Nb):
                w_all[s, nb * C:(nb + 1) * C, t * R + nb * C:t * R + (nb + 1) * C] = w_oc[t]
        b_all[s] = np.tile(b_np.reshape(C, 1), (Nb, HW))
    return jnp.asarray(w_all), jnp.asarray(b_all)


def _make_masks(H, W, R):
    """(9, R, HW) f32 border-validity masks (zero-padding emulation), pre-broadcast."""
    HW = H * W
    hh = np.arange(HW) // W
    ww = np.arange(HW) % W
    ms = []
    for ky in range(3):
        for kx in range(3):
            dy, dx = ky - 1, kx - 1
            valid = ((hh + dy >= 0) & (hh + dy < H) & (ww + dx >= 0) & (ww + dx < W))
            ms.append(np.broadcast_to(valid.astype(np.float32), (R, HW)))
    return jnp.asarray(np.stack(ms, 0))


def add_module_forward(x1_nchw, x2_nchw, params):
    """Forward pass matching the PyTorch module's NCHW interface."""
    N, C, H, W = x1_nchw.shape
    HW = H * W
    Nb = _pick_nb(N, C, HW)
    R = Nb * C

    w_all, b_all = _pack_params(params, Nb, H, W)   # (3, R, 9R), (3, R, HW)
    m_all = _make_masks(H, W, R)                    # (9, R, HW)

    # Free contiguous reshapes (no transpose, no extra HBM pass).
    x1f = x1_nchw.reshape(N * C, HW)
    x2f = x2_nchw.reshape(N * C, HW)

    out = pl.pallas_call(
        _make_kernel(H, W, C, Nb),
        out_shape=jax.ShapeDtypeStruct((N * C, HW), x1_nchw.dtype),
        grid_spec=pltpu.PrefetchScalarGridSpec(
            num_scalar_prefetch=0,
            grid=(N // Nb,),
            in_specs=[
                pl.BlockSpec((R, HW), lambda n: (n, 0)),
                pl.BlockSpec((R, HW), lambda n: (n, 0)),
                # constant index_map -> weights / bias / masks stay VMEM-resident
                pl.BlockSpec((N_STAGES, R, 9 * R), lambda n: (0, 0, 0)),
                pl.BlockSpec((N_STAGES, R, HW), lambda n: (0, 0, 0)),
                pl.BlockSpec((9, R, HW), lambda n: (0, 0, 0)),
            ],
            out_specs=pl.BlockSpec((R, HW), lambda n: (n, 0)),
        ),
        compiler_params=pltpu.CompilerParams(
            dimension_semantics=("parallel",),          # megacore on v7x
            vmem_limit_bytes=32 * 1024 * 1024,          # safe on v5e/v6e/v7x
        ),
    )(x1f, x2f, w_all, b_all, m_all)
    return out.reshape(N, C, H, W)


def init_params(key, channels):
    """Deterministic init mimicking nn.Conv2d defaults (uniform +/- 1/sqrt(fan_in))."""
    fan_in = channels * 3 * 3
    bound = 1.0 / float(fan_in) ** 0.5
    params = []
    for _ in range(N_STAGES):
        key, kw, kb = jax.random.split(key, 3)
        w = jax.random.uniform(kw, (3, 3, channels, channels),
                               jnp.float32, -bound, bound)   # HWIO
        b = jax.random.uniform(kb, (channels,), jnp.float32, -bound, bound)
        params.append((w, b))
    return params


def ref_forward(x1, x2, params):
    """Pure-JAX reference (lax.conv, NCHW) for correctness checking."""
    x = x1 + x2
    for w, b in params:
        y = lax.conv_general_dilated(
            x, w, window_strides=(1, 1), padding='SAME',
            dimension_numbers=('NCHW', 'HWIO', 'NCHW'))
        y = y + b.reshape(1, -1, 1, 1)
        x = jnp.where(y > 0, y, NEG_SLOPE * y)
    return x


if __name__ == "__main__":
    key = jax.random.PRNGKey(0)
    k1, k2, kp = jax.random.split(key, 3)

    N, C, H, W = 2, 4, 16, 16
    x1 = jax.random.normal(k1, (N, C, H, W), jnp.float32)
    x2 = jax.random.normal(k2, (N, C, H, W), jnp.float32)
    params = init_params(kp, C)

    out = jax.block_until_ready(add_module_forward(x1, x2, params))
    ref = jax.block_until_ready(ref_forward(x1, x2, params))

    assert out.shape == (N, C, H, W)
    err = float(jnp.max(jnp.abs(out - ref)))
    assert jnp.allclose(out, ref, atol=1e-4, rtol=1e-4), f"mismatch vs reference, max err {err:e}"

    print("KERNEL_OK")
</pallas_src>

<mosaic_0001>
module attributes {stable_mosaic.version = 11 : i64} {
  func.func @kernel(%arg0: i32, %arg1: memref<8x256xf32, #tpu.memory_space<vmem>>, %arg2: memref<8x256xf32, #tpu.memory_space<vmem>>, %arg3: memref<3x8x72xf32, #tpu.memory_space<vmem>>, %arg4: memref<3x8x256xf32, #tpu.memory_space<vmem>>, %arg5: memref<9x8x256xf32, #tpu.memory_space<vmem>>, %arg6: memref<8x256xf32, #tpu.memory_space<vmem>>) attributes {dimension_semantics = [#tpu.dimension_semantics<parallel>], iteration_bounds = array<i64: 1>, scalar_prefetch = 0 : i64, scratch_operands = 0 : i64, tpu.core_type = #tpu.core_type<tc>, window_params = [{transform_indices = @transform_0, window_bounds = array<i64: 8, 256>}, {transform_indices = @transform_1, window_bounds = array<i64: 8, 256>}, {pipeline_mode = #tpu.pipeline_mode<synchronous>, transform_indices = @transform_2, window_bounds = array<i64: 3, 8, 72>}, {pipeline_mode = #tpu.pipeline_mode<synchronous>, transform_indices = @transform_3, window_bounds = array<i64: 3, 8, 256>}, {pipeline_mode = #tpu.pipeline_mode<synchronous>, transform_indices = @transform_4, window_bounds = array<i64: 9, 8, 256>}, {transform_indices = @transform_5, window_bounds = array<i64: 8, 256>}]} {
    %c0 = arith.constant 0 : index
    %c0_0 = arith.constant 0 : index
    %0 = vector.load %arg1[%c0, %c0_0] : memref<8x256xf32, #tpu.memory_space<vmem>>, vector<8x256xf32>
    %c0_1 = arith.constant 0 : index
    %c0_2 = arith.constant 0 : index
    %1 = vector.load %arg2[%c0_1, %c0_2] : memref<8x256xf32, #tpu.memory_space<vmem>>, vector<8x256xf32>
    %2 = arith.addf %0, %1 : vector<8x256xf32>
    %c0_3 = arith.constant 0 : index
    %c0_4 = arith.constant 0 : index
    %c0_5 = arith.constant 0 : index
    %3 = vector.load %arg3[%c0_3, %c0_4, %c0_5] : memref<3x8x72xf32, #tpu.memory_space<vmem>>, vector<1x8x72xf32>
    %4 = vector.shape_cast %3 : vector<1x8x72xf32> to vector<8x72xf32>
    %c17_i32 = arith.constant 17 : i32
    %5 = tpu.dynamic_rotate %2 by %c17_i32 dim 1 : vector<8x256xf32>, i32 -> vector<8x256xf32>
    %c0_6 = arith.constant 0 : index
    %c0_7 = arith.constant 0 : index
    %c0_8 = arith.constant 0 : index
    %6 = vector.load %arg5[%c0_6, %c0_7, %c0_8] : memref<9x8x256xf32, #tpu.memory_space<vmem>>, vector<1x8x256xf32>
    %7 = vector.shape_cast %6 : vector<1x8x256xf32> to vector<8x256xf32>
    %8 = arith.mulf %5, %7 : vector<8x256xf32>
    %c16_i32 = arith.constant 16 : i32
    %9 = tpu.dynamic_rotate %2 by %c16_i32 dim 1 : vector<8x256xf32>, i32 -> vector<8x256xf32>
    %c1 = arith.constant 1 : index
    %c0_9 = arith.constant 0 : index
    %c0_10 = arith.constant 0 : index
    %10 = vector.load %arg5[%c1, %c0_9, %c0_10] : memref<9x8x256xf32, #tpu.memory_space<vmem>>, vector<1x8x256xf32>
    %11 = vector.shape_cast %10 : vector<1x8x256xf32> to vector<8x256xf32>
    %12 = arith.mulf %9, %11 : vector<8x256xf32>
    %c15_i32 = arith.constant 15 : i32
    %13 = tpu.dynamic_rotate %2 by %c15_i32 dim 1 : vector<8x256xf32>, i32 -> vector<8x256xf32>
    %c2 = arith.constant 2 : index
    %c0_11 = arith.constant 0 : index
    %c0_12 = arith.constant 0 : index
    %14 = vector.load %arg5[%c2, %c0_11, %c0_12] : memref<9x8x256xf32, #tpu.memory_space<vmem>>, vector<1x8x256xf32>
    %15 = vector.shape_cast %14 : vector<1x8x256xf32> to vector<8x256xf32>
    %16 = arith.mulf %13, %15 : vector<8x256xf32>
    %c1_i32 = arith.constant 1 : i32
    %17 = tpu.dynamic_rotate %2 by %c1_i32 dim 1 : vector<8x256xf32>, i32 -> vector<8x256xf32>
    %c3 = arith.constant 3 : index
    %c0_13 = arith.constant 0 : index
    %c0_14 = arith.constant 0 : index
    %18 = vector.load %arg5[%c3, %c0_13, %c0_14] : memref<9x8x256xf32, #tpu.memory_space<vmem>>, vector<1x8x256xf32>
    %19 = vector.shape_cast %18 : vector<1x8x256xf32> to vector<8x256xf32>
    %20 = arith.mulf %17, %19 : vector<8x256xf32>
    %c255_i32 = arith.constant 255 : i32
    %21 = tpu.dynamic_rotate %2 by %c255_i32 dim 1 : vector<8x256xf32>, i32 -> vector<8x256xf32>
    %c5 = arith.constant 5 : index
    %c0_15 = arith.constant 0 : index
    %c0_16 = arith.constant 0 : index
    %22 = vector.load %arg5[%c5, %c0_15, %c0_16] : memref<9x8x256xf32, #tpu.memory_space<vmem>>, vector<1x8x256xf32>
    %23 = vector.shape_cast %22 : vector<1x8x256xf32> to vector<8x256xf32>
    %24 = arith.mulf %21, %23 : vector<8x256xf32>
    %c241_i32 = arith.constant 241 : i32
    %25 = tpu.dynamic_rotate %2 by %c241_i32 dim 1 : vector<8x256xf32>, i32 -> vector<8x256xf32>
    %c6 = arith.constant 6 : index
    %c0_17 = arith.constant 0 : index
    %c0_18 = arith.constant 0 : index
    %26 = vector.load %arg5[%c6, %c0_17, %c0_18] : memref<9x8x256xf32, #tpu.memory_space<vmem>>, vector<1x8x256xf32>
    %27 = vector.shape_cast %26 : vector<1x8x256xf32> to vector<8x256xf32>
    %28 = arith.mulf %25, %27 : vector<8x256xf32>
    %c240_i32 = arith.constant 240 : i32
    %29 = tpu.dynamic_rotate %2 by %c240_i32 dim 1 : vector<8x256xf32>, i32 -> vector<8x256xf32>
    %c7 = arith.constant 7 : index
    %c0_19 = arith.constant 0 : index
    %c0_20 = arith.constant 0 : index
    %30 = vector.load %arg5[%c7, %c0_19, %c0_20] : memref<9x8x256xf32, #tpu.memory_space<vmem>>, vector<1x8x256xf32>
    %31 = vector.shape_cast %30 : vector<1x8x256xf32> to vector<8x256xf32>
    %32 = arith.mulf %29, %31 : vector<8x256xf32>
    %c239_i32 = arith.constant 239 : i32
    %33 = tpu.dynamic_rotate %2 by %c239_i32 dim 1 : vector<8x256xf32>, i32 -> vector<8x256xf32>
    %c8 = arith.constant 8 : index
    %c0_21 = arith.constant 0 : index
    %c0_22 = arith.constant 0 : index
    %34 = vector.load %arg5[%c8, %c0_21, %c0_22] : memref<9x8x256xf32, #tpu.memory_space<vmem>>, vector<1x8x256xf32>
    %35 = vector.shape_cast %34 : vector<1x8x256xf32> to vector<8x256xf32>
    %36 = arith.mulf %33, %35 : vector<8x256xf32>
    %37 = tpu.concatenate %8, %12, %16, %20, %2, %24, %28, %32, %36 in 0 : vector<8x256xf32>, vector<8x256xf32>, vector<8x256xf32>, vector<8x256xf32>, vector<8x256xf32>, vector<8x256xf32>, vector<8x256xf32>, vector<8x256xf32>, vector<8x256xf32> -> vector<72x256xf32>
    %cst = arith.constant dense<0.000000e+00> : vector<8x256xf32>
    %38 = tpu.matmul %4, %37, %cst {dimension_numbers = #tpu.dot_dimension_numbers<[1], [0], [0], [1], [0, 0, 1, 1], [], []>} : vector<8x72xf32>, vector<72x256xf32>, vector<8x256xf32> -> vector<8x256xf32>
    %c0_23 = arith.constant 0 : index
    %c0_24 = arith.constant 0 : index
    %c0_25 = arith.constant 0 : index
    %39 = vector.load %arg4[%c0_23, %c0_24, %c0_25] : memref<3x8x256xf32, #tpu.memory_space<vmem>>, vector<1x8x256xf32>
    %40 = vector.shape_cast %39 : vector<1x8x256xf32> to vector<8x256xf32>
    %41 = arith.addf %38, %40 : vector<8x256xf32>
    %cst_26 = arith.constant 0.000000e+00 : f32
    %42 = vector.broadcast %cst_26 : f32 to vector<8x256xf32>
    %43 = arith.cmpf ogt, %41, %42 : vector<8x256xf32>
    %cst_27 = arith.constant 0.00999999977 : f32
    %44 = vector.broadcast %cst_27 : f32 to vector<8x256xf32>
    %45 = arith.mulf %44, %41 : vector<8x256xf32>
    %46 = arith.select %43, %41, %45 : vector<8x256xi1>, vector<8x256xf32>
    %c1_28 = arith.constant 1 : index
    %c0_29 = arith.constant 0 : index
    %c0_30 = arith.constant 0 : index
    %47 = vector.load %arg3[%c1_28, %c0_29, %c0_30] : memref<3x8x72xf32, #tpu.memory_space<vmem>>, vector<1x8x72xf32>
    %48 = vector.shape_cast %47 : vector<1x8x72xf32> to vector<8x72xf32>
    %c17_i32_31 = arith.constant 17 : i32
    %49 = tpu.dynamic_rotate %46 by %c17_i32_31 dim 1 : vector<8x256xf32>, i32 -> vector<8x256xf32>
    %c0_32 = arith.constant 0 : index
    %c0_33 = arith.constant 0 : index
    %c0_34 = arith.constant 0 : index
    %50 = vector.load %arg5[%c0_32, %c0_33, %c0_34] : memref<9x8x256xf32, #tpu.memory_space<vmem>>, vector<1x8x256xf32>
    %51 = vector.shape_cast %50 : vector<1x8x256xf32> to vector<8x256xf32>
    %52 = arith.mulf %49, %51 : vector<8x256xf32>
    %c16_i32_35 = arith.constant 16 : i32
    %53 = tpu.dynamic_rotate %46 by %c16_i32_35 dim 1 : vector<8x256xf32>, i32 -> vector<8x256xf32>
    %c1_36 = arith.constant 1 : index
    %c0_37 = arith.constant 0 : index
    %c0_38 = arith.constant 0 : index
    %54 = vector.load %arg5[%c1_36, %c0_37, %c0_38] : memref<9x8x256xf32, #tpu.memory_space<vmem>>, vector<1x8x256xf32>
    %55 = vector.shape_cast %54 : vector<1x8x256xf32> to vector<8x256xf32>
    %56 = arith.mulf %53, %55 : vector<8x256xf32>
    %c15_i32_39 = arith.constant 15 : i32
    %57 = tpu.dynamic_rotate %46 by %c15_i32_39 dim 1 : vector<8x256xf32>, i32 -> vector<8x256xf32>
    %c2_40 = arith.constant 2 : index
    %c0_41 = arith.constant 0 : index
    %c0_42 = arith.constant 0 : index
    %58 = vector.load %arg5[%c2_40, %c0_41, %c0_42] : memref<9x8x256xf32, #tpu.memory_space<vmem>>, vector<1x8x256xf32>
    %59 = vector.shape_cast %58 : vector<1x8x256xf32> to vector<8x256xf32>
    %60 = arith.mulf %57, %59 : vector<8x256xf32>
    %c1_i32_43 = arith.constant 1 : i32
    %61 = tpu.dynamic_rotate %46 by %c1_i32_43 dim 1 : vector<8x256xf32>, i32 -> vector<8x256xf32>
    %c3_44 = arith.constant 3 : index
    %c0_45 = arith.constant 0 : index
    %c0_46 = arith.constant 0 : index
    %62 = vector.load %arg5[%c3_44, %c0_45, %c0_46] : memref<9x8x256xf32, #tpu.memory_space<vmem>>, vector<1x8x256xf32>
    %63 = vector.shape_cast %62 : vector<1x8x256xf32> to vector<8x256xf32>
    %64 = arith.mulf %61, %63 : vector<8x256xf32>
    %c255_i32_47 = arith.constant 255 : i32
    %65 = tpu.dynamic_rotate %46 by %c255_i32_47 dim 1 : vector<8x256xf32>, i32 -> vector<8x256xf32>
    %c5_48 = arith.constant 5 : index
    %c0_49 = arith.constant 0 : index
    %c0_50 = arith.constant 0 : index
    %66 = vector.load %arg5[%c5_48, %c0_49, %c0_50] : memref<9x8x256xf32, #tpu.memory_space<vmem>>, vector<1x8x256xf32>
    %67 = vector.shape_cast %66 : vector<1x8x256xf32> to vector<8x256xf32>
    %68 = arith.mulf %65, %67 : vector<8x256xf32>
    %c241_i32_51 = arith.constant 241 : i32
    %69 = tpu.dynamic_rotate %46 by %c241_i32_51 dim 1 : vector<8x256xf32>, i32 -> vector<8x256xf32>
    %c6_52 = arith.constant 6 : index
    %c0_53 = arith.constant 0 : index
    %c0_54 = arith.constant 0 : index
    %70 = vector.load %arg5[%c6_52, %c0_53, %c0_54] : memref<9x8x256xf32, #tpu.memory_space<vmem>>, vector<1x8x256xf32>
    %71 = vector.shape_cast %70 : vector<1x8x256xf32> to vector<8x256xf32>
    %72 = arith.mulf %69, %71 : vector<8x256xf32>
    %c240_i32_55 = arith.constant 240 : i32
    %73 = tpu.dynamic_rotate %46 by %c240_i32_55 dim 1 : vector<8x256xf32>, i32 -> vector<8x256xf32>
    %c7_56 = arith.constant 7 : index
    %c0_57 = arith.constant 0 : index
    %c0_58 = arith.constant 0 : index
    %74 = vector.load %arg5[%c7_56, %c0_57, %c0_58] : memref<9x8x256xf32, #tpu.memory_space<vmem>>, vector<1x8x256xf32>
    %75 = vector.shape_cast %74 : vector<1x8x256xf32> to vector<8x256xf32>
    %76 = arith.mulf %73, %75 : vector<8x256xf32>
    %c239_i32_59 = arith.constant 239 : i32
    %77 = tpu.dynamic_rotate %46 by %c239_i32_59 dim 1 : vector<8x256xf32>, i32 -> vector<8x256xf32>
    %c8_60 = arith.constant 8 : index
    %c0_61 = arith.constant 0 : index
    %c0_62 = arith.constant 0 : index
    %78 = vector.load %arg5[%c8_60, %c0_61, %c0_62] : memref<9x8x256xf32, #tpu.memory_space<vmem>>, vector<1x8x256xf32>
    %79 = vector.shape_cast %78 : vector<1x8x256xf32> to vector<8x256xf32>
    %80 = arith.mulf %77, %79 : vector<8x256xf32>
    %81 = tpu.concatenate %52, %56, %60, %64, %46, %68, %72, %76, %80 in 0 : vector<8x256xf32>, vector<8x256xf32>, vector<8x256xf32>, vector<8x256xf32>, vector<8x256xf32>, vector<8x256xf32>, vector<8x256xf32>, vector<8x256xf32>, vector<8x256xf32> -> vector<72x256xf32>
    %cst_63 = arith.constant dense<0.000000e+00> : vector<8x256xf32>
    %82 = tpu.matmul %48, %81, %cst_63 {dimension_numbers = #tpu.dot_dimension_numbers<[1], [0], [0], [1], [0, 0, 1, 1], [], []>} : vector<8x72xf32>, vector<72x256xf32>, vector<8x256xf32> -> vector<8x256xf32>
    %c1_64 = arith.constant 1 : index
    %c0_65 = arith.constant 0 : index
    %c0_66 = arith.constant 0 : index
    %83 = vector.load %arg4[%c1_64, %c0_65, %c0_66] : memref<3x8x256xf32, #tpu.memory_space<vmem>>, vector<1x8x256xf32>
    %84 = vector.shape_cast %83 : vector<1x8x256xf32> to vector<8x256xf32>
    %85 = arith.addf %82, %84 : vector<8x256xf32>
    %cst_67 = arith.constant 0.000000e+00 : f32
    %86 = vector.broadcast %cst_67 : f32 to vector<8x256xf32>
    %87 = arith.cmpf ogt, %85, %86 : vector<8x256xf32>
    %cst_68 = arith.constant 0.00999999977 : f32
    %88 = vector.broadcast %cst_68 : f32 to vector<8x256xf32>
    %89 = arith.mulf %88, %85 : vector<8x256xf32>
    %90 = arith.select %87, %85, %89 : vector<8x256xi1>, vector<8x256xf32>
    %c2_69 = arith.constant 2 : index
    %c0_70 = arith.constant 0 : index
    %c0_71 = arith.constant 0 : index
    %91 = vector.load %arg3[%c2_69, %c0_70, %c0_71] : memref<3x8x72xf32, #tpu.memory_space<vmem>>, vector<1x8x72xf32>
    %92 = vector.shape_cast %91 : vector<1x8x72xf32> to vector<8x72xf32>
    %c17_i32_72 = arith.constant 17 : i32
    %93 = tpu.dynamic_rotate %90 by %c17_i32_72 dim 1 : vector<8x256xf32>, i32 -> vector<8x256xf32>
    %c0_73 = arith.constant 0 : index
    %c0_74 = arith.constant 0 : index
    %c0_75 = arith.constant 0 : index
    %94 = vector.load %arg5[%c0_73, %c0_74, %c0_75] : memref<9x8x256xf32, #tpu.memory_space<vmem>>, vector<1x8x256xf32>
    %95 = vector.shape_cast %94 : vector<1x8x256xf32> to vector<8x256xf32>
    %96 = arith.mulf %93, %95 : vector<8x256xf32>
    %c16_i32_76 = arith.constant 16 : i32
    %97 = tpu.dynamic_rotate %90 by %c16_i32_76 dim 1 : vector<8x256xf32>, i32 -> vector<8x256xf32>
    %c1_77 = arith.constant 1 : index
    %c0_78 = arith.constant 0 : index
    %c0_79 = arith.constant 0 : index
    %98 = vector.load %arg5[%c1_77, %c0_78, %c0_79] : memref<9x8x256xf32, #tpu.memory_space<vmem>>, vector<1x8x256xf32>
    %99 = vector.shape_cast %98 : vector<1x8x256xf32> to vector<8x256xf32>
    %100 = arith.mulf %97, %99 : vector<8x256xf32>
    %c15_i32_80 = arith.constant 15 : i32
    %101 = tpu.dynamic_rotate %90 by %c15_i32_80 dim 1 : vector<8x256xf32>, i32 -> vector<8x256xf32>
    %c2_81 = arith.constant 2 : index
    %c0_82 = arith.constant 0 : index
    %c0_83 = arith.constant 0 : index
    %102 = vector.load %arg5[%c2_81, %c0_82, %c0_83] : memref<9x8x256xf32, #tpu.memory_space<vmem>>, vector<1x8x256xf32>
    %103 = vector.shape_cast %102 : vector<1x8x256xf32> to vector<8x256xf32>
    %104 = arith.mulf %101, %103 : vector<8x256xf32>
    %c1_i32_84 = arith.constant 1 : i32
    %105 = tpu.dynamic_rotate %90 by %c1_i32_84 dim 1 : vector<8x256xf32>, i32 -> vector<8x256xf32>
    %c3_85 = arith.constant 3 : index
    %c0_86 = arith.constant 0 : index
    %c0_87 = arith.constant 0 : index
    %106 = vector.load %arg5[%c3_85, %c0_86, %c0_87] : memref<9x8x256xf32, #tpu.memory_space<vmem>>, vector<1x8x256xf32>
    %107 = vector.shape_cast %106 : vector<1x8x256xf32> to vector<8x256xf32>
    %108 = arith.mulf %105, %107 : vector<8x256xf32>
    %c255_i32_88 = arith.constant 255 : i32
    %109 = tpu.dynamic_rotate %90 by %c255_i32_88 dim 1 : vector<8x256xf32>, i32 -> vector<8x256xf32>
    %c5_89 = arith.constant 5 : index
    %c0_90 = arith.constant 0 : index
    %c0_91 = arith.constant 0 : index
    %110 = vector.load %arg5[%c5_89, %c0_90, %c0_91] : memref<9x8x256xf32, #tpu.memory_space<vmem>>, vector<1x8x256xf32>
    %111 = vector.shape_cast %110 : vector<1x8x256xf32> to vector<8x256xf32>
    %112 = arith.mulf %109, %111 : vector<8x256xf32>
    %c241_i32_92 = arith.constant 241 : i32
    %113 = tpu.dynamic_rotate %90 by %c241_i32_92 dim 1 : vector<8x256xf32>, i32 -> vector<8x256xf32>
    %c6_93 = arith.constant 6 : index
    %c0_94 = arith.constant 0 : index
    %c0_95 = arith.constant 0 : index
    %114 = vector.load %arg5[%c6_93, %c0_94, %c0_95] : memref<9x8x256xf32, #tpu.memory_space<vmem>>, vector<1x8x256xf32>
    %115 = vector.shape_cast %114 : vector<1x8x256xf32> to vector<8x256xf32>
    %116 = arith.mulf %113, %115 : vector<8x256xf32>
    %c240_i32_96 = arith.constant 240 : i32
    %117 = tpu.dynamic_rotate %90 by %c240_i32_96 dim 1 : vector<8x256xf32>, i32 -> vector<8x256xf32>
    %c7_97 = arith.constant 7 : index
    %c0_98 = arith.constant 0 : index
    %c0_99 = arith.constant 0 : index
    %118 = vector.load %arg5[%c7_97, %c0_98, %c0_99] : memref<9x8x256xf32, #tpu.memory_space<vmem>>, vector<1x8x256xf32>
    %119 = vector.shape_cast %118 : vector<1x8x256xf32> to vector<8x256xf32>
    %120 = arith.mulf %117, %119 : vector<8x256xf32>
    %c239_i32_100 = arith.constant 239 : i32
    %121 = tpu.dynamic_rotate %90 by %c239_i32_100 dim 1 : vector<8x256xf32>, i32 -> vector<8x256xf32>
    %c8_101 = arith.constant 8 : index
    %c0_102 = arith.constant 0 : index
    %c0_103 = arith.constant 0 : index
    %122 = vector.load %arg5[%c8_101, %c0_102, %c0_103] : memref<9x8x256xf32, #tpu.memory_space<vmem>>, vector<1x8x256xf32>
    %123 = vector.shape_cast %122 : vector<1x8x256xf32> to vector<8x256xf32>
    %124 = arith.mulf %121, %123 : vector<8x256xf32>
    %125 = tpu.concatenate %96, %100, %104, %108, %90, %112, %116, %120, %124 in 0 : vector<8x256xf32>, vector<8x256xf32>, vector<8x256xf32>, vector<8x256xf32>, vector<8x256xf32>, vector<8x256xf32>, vector<8x256xf32>, vector<8x256xf32>, vector<8x256xf32> -> vector<72x256xf32>
    %cst_104 = arith.constant dense<0.000000e+00> : vector<8x256xf32>
    %126 = tpu.matmul %92, %125, %cst_104 {dimension_numbers = #tpu.dot_dimension_numbers<[1], [0], [0], [1], [0, 0, 1, 1], [], []>} : vector<8x72xf32>, vector<72x256xf32>, vector<8x256xf32> -> vector<8x256xf32>
    %c2_105 = arith.constant 2 : index
    %c0_106 = arith.constant 0 : index
    %c0_107 = arith.constant 0 : index
    %127 = vector.load %arg4[%c2_105, %c0_106, %c0_107] : memref<3x8x256xf32, #tpu.memory_space<vmem>>, vector<1x8x256xf32>
    %128 = vector.shape_cast %127 : vector<1x8x256xf32> to vector<8x256xf32>
    %129 = arith.addf %126, %128 : vector<8x256xf32>
    %cst_108 = arith.constant 0.000000e+00 : f32
    %130 = vector.broadcast %cst_108 : f32 to vector<8x256xf32>
    %131 = arith.cmpf ogt, %129, %130 : vector<8x256xf32>
    %cst_109 = arith.constant 0.00999999977 : f32
    %132 = vector.broadcast %cst_109 : f32 to vector<8x256xf32>
    %133 = arith.mulf %132, %129 : vector<8x256xf32>
    %134 = arith.select %131, %129, %133 : vector<8x256xi1>, vector<8x256xf32>
    %c0_110 = arith.constant 0 : index
    %c0_111 = arith.constant 0 : index
    %135 = vector.load %arg6[%c0_110, %c0_111] : memref<8x256xf32, #tpu.memory_space<vmem>>, vector<8x256xf32>
    tpu.vector_store %arg6[%c0_110, %c0_111], %134 {strides = array<i32>} : memref<8x256xf32, #tpu.memory_space<vmem>>, vector<8x256xf32>,
    return
  }
  func.func @transform_0(%arg0: i32) -> (i32, i32) {
    %c0_i32 = arith.constant 0 : i32
    %c0_i32_0 = arith.constant 0 : i32
    return %arg0, %c0_i32 : i32, i32
  }
  func.func @transform_1(%arg0: i32) -> (i32, i32) {
    %c0_i32 = arith.constant 0 : i32
    %c0_i32_0 = arith.constant 0 : i32
    return %arg0, %c0_i32 : i32, i32
  }
  func.func @transform_2(%arg0: i32) -> (i32, i32, i32) {
    %c0_i32 = arith.constant 0 : i32
    %c0_i32_0 = arith.constant 0 : i32
    %c0_i32_1 = arith.constant 0 : i32
    %c0_i32_2 = arith.constant 0 : i32
    return %c0_i32, %c0_i32_0, %c0_i32_1 : i32, i32, i32
  }
  func.func @transform_3(%arg0: i32) -> (i32, i32, i32) {
    %c0_i32 = arith.constant 0 : i32
    %c0_i32_0 = arith.constant 0 : i32
    %c0_i32_1 = arith.constant 0 : i32
    %c0_i32_2 = arith.constant 0 : i32
    return %c0_i32, %c0_i32_0, %c0_i32_1 : i32, i32, i32
  }
  func.func @transform_4(%arg0: i32) -> (i32, i32, i32) {
    %c0_i32 = arith.constant 0 : i32
    %c0_i32_0 = arith.constant 0 : i32
    %c0_i32_1 = arith.constant 0 : i32
    %c0_i32_2 = arith.constant 0 : i32
    return %c0_i32, %c0_i32_0, %c0_i32_1 : i32, i32, i32
  }
  func.func @transform_5(%arg0: i32) -> (i32, i32) {
    %c0_i32 = arith.constant 0 : i32
    %c0_i32_0 = arith.constant 0 : i32
    return %arg0, %c0_i32 : i32, i32
  }
}

</mosaic_0001>

<bundles_post_ra>
// kernel: tpu_custom_call.1
= control target key start
LH: loop header
LB: loop body
LE: loop exit
PB: predicated region body
PF: predicated region fallthrough
CT: control target
= control target key end

     0   :  { %10 = vsyncpa [#allocation3], 0  ;;  %s1222_s0 = inlined_call_operand.hbm [shape: f32[8,256], index: 0, kind: input, shape index: {}]   ;;  %s1223_s1 = inlined_call_operand.hbm [shape: f32[8,256], index: 1, kind: input, shape index: {}]   ;;  %s1224_s2 = inlined_call_operand.hbm [shape: f32[3,8,72], index: 2, kind: input, shape index: {}]   ;;  %s1225_s3 = inlined_call_operand.hbm [shape: f32[3,8,256], index: 3, kind: input, shape index: {}]   ;;  %s1226_s4 = inlined_call_operand.hbm [shape: f32[9,8,256], index: 4, kind: input, shape index: {}]   ;;  %s1227_s5 = inlined_call_operand.hbm [shape: f32[8,256], index: 5, kind: output, shape index: {}]  }
   0x1   :  { %11 = vsyncpa [#allocation6], 0 }
   0x2   :  { %12 = vsyncpa [#allocation9], 0 }
   0x3   :  { %13 = vsyncpa [#allocation4], 0  ;;  %s798_s18 = smov [#allocation5]   ;;  %s799_s20 = smov [#allocation8]  }
   0x4   :  { %s30_s19 = sshll.u32 %s798_s18, 4  ;;  %s51_s21 = sshll.u32 %s799_s20, 4  ;;  %s31_s19 = int_to_ptr.vmem [resolvable:$true] %s30_s19  ;;  %s846_s21 = int_to_ptr.vmem [resolvable:$true] %s51_s21 }
   0x5   :  { %s658_s24 = scalar_lea.hbm %s1223_s1, 256 }
   0x6   :  { %p659_p0 = scmp.ne.s32.totalorder %s1223_s1, %s658_s24  ;;  %p662_p1 = scmp.lt.u32.totalorder %s658_s24, %s1223_s1 }
   0x8   :  { %p664_p2 = pnand %p662_p1, %p659_p0 }
   0xa   :  { %667 = shalt.err (!%p664_p2)
}
   0xb   :  { %s668_s29 = scalar_lea.vmem %s31_s19, 256  ;;  %p673_p4 = scmp.lt.s32.totalorder %s31_s19, %s31_s19 }
   0xc   :  { %p669_p3 = scmp.ne.s32.totalorder %s31_s19, %s668_s29  ;;  %p674_p5 = scmp.lt.s32.totalorder %s668_s29, %s668_s29 }
   0xe   :  { %p675_p6 = por %p674_p5, %p673_p4 }
  0x10   :  { %p676_p7 = pnand %p675_p6, %p669_p3 }
  0x12   :  { %679 = shalt.err (!%p676_p7)
}
  0x13   :  { %33 = dma.hbm_to_vmem [thread:$0]  %s1223_s1, 256, %s31_s19, [#allocation6]  }
  0x14   :  { %s680_s9 = scalar_lea.hbm %s1225_s3, 768 }
  0x15   :  { %p681_p8 = scmp.ne.s32.totalorder %s1225_s3, %s680_s9  ;;  %p684_p9 = scmp.lt.u32.totalorder %s680_s9, %s1225_s3 }
  0x17   :  { %p686_p10 = pnand %p684_p9, %p681_p8 }
  0x19   :  { %689 = shalt.err (!%p686_p10)
}
  0x1a   :  { %s690_s14 = scalar_lea.vmem %s846_s21, 768  ;;  %p695_p12 = scmp.lt.s32.totalorder %s846_s21, %s846_s21 }
  0x1b   :  { %p691_p11 = scmp.ne.s32.totalorder %s846_s21, %s690_s14  ;;  %p696_p13 = scmp.lt.s32.totalorder %s690_s14, %s690_s14 }
  0x1d   :  { %p697_p0 = por %p696_p13, %p695_p12 }
  0x1f   :  { %p698_p1 = pnand %p697_p0, %p691_p11 }
  0x21   :  { %701 = shalt.err (!%p698_p1)
}
  0x22   :  { %s800_s1 = smov 256   ;;  %s801_s15 = smov 16  }
  0x23   :  { %57 = dma.hbm_to_vmem [thread:$0]  %s1225_s3, 768, %s846_s21, [#allocation9], %s800_s1, %s800_s1, %s801_s15  }
  0x24   :  { %s802_s18 = smov [#allocation2]   ;;  %s803_s20 = smov [#allocation7]  }
  0x25   :  { %s20_s19 = sshll.u32 %s802_s18, 4  ;;  %s39_s22 = sshll.u32 %s803_s20, 4  ;;  %s21_s19 = int_to_ptr.vmem [resolvable:$true] %s20_s19  ;;  %s880_s22 = int_to_ptr.vmem [resolvable:$true] %s39_s22 }
  0x26   :  { %s702_s25 = scalar_lea.hbm %s1222_s0, 256 }
  0x27   :  { %p703_p2 = scmp.ne.s32.totalorder %s1222_s0, %s702_s25  ;;  %p706_p3 = scmp.lt.u32.totalorder %s702_s25, %s1222_s0 }
  0x29   :  { %p708_p4 = pnand %p706_p3, %p703_p2 }
  0x2b   :  { %711 = shalt.err (!%p708_p4)
}
  0x2c   :  { %s712_s3 = scalar_lea.vmem %s21_s19, 256  ;;  %p717_p6 = scmp.lt.s32.totalorder %s21_s19, %s21_s19 }
  0x2d   :  { %p713_p5 = scmp.ne.s32.totalorder %s21_s19, %s712_s3  ;;  %p718_p7 = scmp.lt.s32.totalorder %s712_s3, %s712_s3 }
  0x2f   :  { %p719_p8 = por %p718_p7, %p717_p6 }
  0x31   :  { %p720_p9 = pnand %p719_p8, %p713_p5 }
  0x33   :  { %723 = shalt.err (!%p720_p9)
}
  0x34   :  { %23 = dma.hbm_to_vmem [thread:$0]  %s1222_s0, 256, %s21_s19, [#allocation3]  }
  0x35   :  { %s724_s8 = scalar_lea.hbm %s1224_s2, 384 }
  0x36   :  { %p725_p10 = scmp.ne.s32.totalorder %s1224_s2, %s724_s8  ;;  %p728_p11 = scmp.lt.u32.totalorder %s724_s8, %s1224_s2 }
  0x38   :  { %p730_p12 = pnand %p728_p11, %p725_p10 }
  0x3a   :  { %733 = shalt.err (!%p730_p12)
}
  0x3b   :  { %s734_s13 = scalar_lea.vmem %s880_s22, 384  ;;  %p739_p0 = scmp.lt.s32.totalorder %s880_s22, %s880_s22 }
  0x3c   :  { %p735_p13 = scmp.ne.s32.totalorder %s880_s22, %s734_s13  ;;  %p740_p1 = scmp.lt.s32.totalorder %s734_s13, %s734_s13 }
  0x3e   :  { %p741_p2 = por %p740_p1, %p739_p0 }
  0x40   :  { %p742_p3 = pnand %p741_p2, %p735_p13 }
  0x42   :  { %745 = shalt.err (!%p742_p3)
}
  0x43   :  { %s804_s0 = smov 128   ;;  %s805_s14 = smov 8  }
  0x44   :  { %45 = dma.hbm_to_vmem [thread:$0]  %s1224_s2, 384, %s880_s22, [#allocation6], %s804_s0, %s804_s0, %s805_s14  }
  0x45   :  { %s806_s18 = smov [#allocation10]   ;;  %s746_s24 = scalar_lea.hbm %s1226_s4, 2304 }
  0x46   :  { %s63_s19 = sshll.u32 %s806_s18, 4  ;;  %p747_p4 = scmp.ne.s32.totalorder %s1226_s4, %s746_s24  ;;  %s64_s19 = int_to_ptr.vmem [resolvable:$true] %s63_s19 }
  0x47   :  { %p750_p5 = scmp.lt.u32.totalorder %s746_s24, %s1226_s4 }
  0x49   :  { %p752_p6 = pnand %p750_p5, %p747_p4 }
  0x4b   :  { %755 = shalt.err (!%p752_p6)
}
  0x4c   :  { %s756_s29 = scalar_lea.vmem %s64_s19, 2304  ;;  %p761_p8 = scmp.lt.s32.totalorder %s64_s19, %s64_s19 }
  0x4d   :  { %p757_p7 = scmp.ne.s32.totalorder %s64_s19, %s756_s29  ;;  %p762_p9 = scmp.lt.s32.totalorder %s756_s29, %s756_s29 }
  0x4f   :  { %p763_p10 = por %p762_p9, %p761_p8 }
  0x51   :  { %p764_p11 = pnand %p763_p10, %p757_p7 }
  0x53   :  { %767 = shalt.err (!%p764_p11)
}
  0x54   :  { %69 = dma.hbm_to_vmem [thread:$0]  %s1226_s4, 2304, %s64_s19, [#allocation9], %s800_s1, %s800_s1, %s801_s15  }
  0x55   :  { %790 = dma.done.wait [#allocation3], 256  }
  0x56   :  { %791 = vsyncadd [#allocation3], 4294967040 }
  0x57   :  { %792 = dma.done.wait [#allocation6], 640  }
  0x58   :  { %793 = vsyncadd [#allocation6], 4294966656 }
  0x59   :  { %794 = dma.done.wait [#allocation9], 3072  }
  0x5a   :  { %795 = vsyncadd [#allocation9], 4294964224  ;;  %v85_v0 = vld [vmem:[#allocation2] sm:$0xff]  ;;  %v87_v1 = vld [vmem:[#allocation5] sm:$0xff]  ;;  %s807_s3 = smov 17   ;;  %s808_s4 = smov 15   ;;  %v96_v7 = vlaneseq }
  0x5b   :  { %v86_v2 = vld [vmem:[#allocation2 + $0x8] sm:$0xff]  ;;  %v926_v3 = vadd.f32 %v87_v1, %v85_v0  ;;  %v88_v4 = vld [vmem:[#allocation5 + $0x8] sm:$0xff]  ;;  %s809_s1 = smov 1   ;;  %s810_s21 = smov 127   ;;  %v812_v6 = vmov 0.0   ;;  %v972_v13 = vld [vmem:[#allocation10 + $0x8] sm:$0xff] }
  0x5c   :  { %v932_v5 = vadd.f32 %v88_v4, %v86_v2  ;;  %s811_s30 = smov 113   ;;  %259 = vmatprep.mubr.f32.mxu0 %v812_v6  ;;  %408 = vmatprep.mubr.f32.mxu1 %v812_v6  ;;  %s813_s6 = smov 112   ;;  %v964_v8 = vand.u32 127, %v96_v7  ;;  %v967_v11 = vld [vmem:[#allocation10 + $0x10] sm:$0xff]  ;;  %v970_v12 = vld [vmem:[#allocation10] sm:$0xff]  ;;  %v974_v14 = vld [vmem:[#allocation10 + $0x18] sm:$0xff] }
  0x5d   :  { %105 = vrot.lane.b32.xlu1 %v926_v3, %s801_s15  ;;  %92 = vrot.lane.b32.xlu0 %v926_v3, %s807_s3  ;;  %s814_s7 = smov 111   ;;  %v989_v29 = vld [vmem:[#allocation10 + $0x20] sm:$0xff]  ;;  %v992_v30 = vld [vmem:[#allocation10 + $0x28] sm:$0xff]  ;;  %v998_v33 = vld [vmem:[#allocation10 + $0x30] sm:$0xff]  ;;  %vm191_vm8 = vcmask 588800  }
  0x5e   :  { %vm109_vm0 = vcmp.lt.s32.totalorder %v964_v8, 16  ;;  %vm98_vm1 = vcmp.lt.s32.totalorder %v964_v8, 17  ;;  %vm121_vm2 = vcmp.lt.s32.totalorder %v964_v8, 15  ;;  %vm133_vm3 = vcmp.lt.s32.totalorder %v964_v8, 1  ;;  %v1000_v34 = vld [vmem:[#allocation10 + $0x38] sm:$0xff]  ;;  %v1011_v43 = vld [vmem:[#allocation10 + $0x50] sm:$0xff] }
  0x5f   :  { %vm145_vm4 = vcmp.lt.s32.totalorder %v964_v8, 127  ;;  %v1013_v44 = vld [vmem:[#allocation10 + $0x58] sm:$0xff]  ;;  %vm157_vm5 = vcmp.lt.s32.totalorder %v964_v8, 113  ;;  %v1024_v57 = vld [vmem:[#allocation10 + $0x60] sm:$0xff]  ;;  %vm169_vm6 = vcmp.lt.s32.totalorder %v964_v8, 112  ;;  %v1027_v58 = vld [vmem:[#allocation10 + $0x68] sm:$0xff] }
  0x60   :  { %v1033_v61 = vld [vmem:[#allocation10 + $0x70] sm:$0xff]  ;;  %v1035_v62 = vld [vmem:[#allocation10 + $0x78] sm:$0xff]  ;;  %vm181_vm7 = vcmp.lt.s32.totalorder %v964_v8, 111 }
  0x61   :  { %107 = vrot.lane.b32.xlu1 %v932_v5, %s801_s15  ;;  %94 = vrot.lane.b32.xlu0 %v932_v5, %s807_s3 }
  0x65   :  { %119 = vrot.lane.b32.xlu1 %v932_v5, %s808_s4  ;;  %117 = vrot.lane.b32.xlu0 %v926_v3, %s808_s4 }
  0x69   :  { %131 = vrot.lane.b32.xlu1 %v932_v5, %s809_s1  ;;  %129 = vrot.lane.b32.xlu0 %v926_v3, %s809_s1 }
  0x6d   :  { %143 = vrot.lane.b32.xlu1 %v932_v5, %s810_s21  ;;  %141 = vrot.lane.b32.xlu0 %v926_v3, %s810_s21 }
  0x71   :  { %155 = vrot.lane.b32.xlu1 %v932_v5, %s811_s30  ;;  %153 = vrot.lane.b32.xlu0 %v926_v3, %s811_s30 }
  0x75   :  { %167 = vrot.lane.b32.xlu1 %v932_v5, %s813_s6  ;;  %165 = vrot.lane.b32.xlu0 %v926_v3, %s813_s6 }
  0x79   :  { %179 = vrot.lane.b32.xlu1 %v932_v5, %s814_s7  ;;  %177 = vrot.lane.b32.xlu0 %v926_v3, %s814_s7 }
  0xcf   :  { %v106_v9 = vpop.permute.xlu1 %105  ;;  %v93_v10 = vpop.permute.xlu0 %92 }
  0xd3   :  { %v108_v15 = vpop.permute.xlu1 %107  ;;  %v95_v16 = vpop.permute.xlu0 %94 }
  0xd4   :  { %v110_v17 = vsel %vm109_vm0, %v106_v9, %v108_v15  ;;  %v111_v18 = vsel %vm109_vm0, %v108_v15, %v106_v9  ;;  %v99_v19 = vsel %vm98_vm1, %v93_v10, %v95_v16  ;;  %v100_v20 = vsel %vm98_vm1, %v95_v16, %v93_v10  ;;  %v1046_v9 = vld [vmem:[#allocation10 + $0x88] sm:$0xff]  ;;  %v1048_v16 = vld [vmem:[#allocation10 + $0x80] sm:$0xff] }
  0xd5   :  { %v115_v21 = vmul.f32 %v967_v11, %v111_v18  ;;  %v103_v22 = vmul.f32 %v970_v12, %v100_v20  ;;  %v104_v23 = vmul.f32 %v972_v13, %v99_v19  ;;  %v116_v24 = vmul.f32 %v974_v14, %v110_v17 }
  0xd7   :  { %v120_v25 = vpop.permute.xlu1 %119  ;;  %v118_v26 = vpop.permute.xlu0 %117  ;;  %v592_v27 = vpack.c.bf16 %v116_v24, %v104_v23  ;;  %v594_v28 = vpack.c.bf16 %v115_v21, %v103_v22  ;;  %v91_v23 = vld [vmem:[#allocation7] sm:$0xff]  ;;  %v189_v24 = vld [vmem:[#allocation8] sm:$0xff] }
  0xd8   :  { %v122_v31 = vsel %vm121_vm2, %v118_v26, %v120_v25  ;;  %v123_v32 = vsel %vm121_vm2, %v120_v25, %v118_v26  ;;  %v190_v25 = vld [vmem:[#allocation8 + $0x8] sm:$0xff] }
  0xd9   :  { %593 = vmatprep.subr.bf16.mxu0 %v592_v27  ;;  %v127_v39 = vmul.f32 %v989_v29, %v123_v32  ;;  %v128_v40 = vmul.f32 %v992_v30, %v122_v31 }
  0xda   :  { %595 = vmatpush1.bf16.msra.mxu0 %v594_v28 }
  0xdb   :  { %v132_v35 = vpop.permute.xlu1 %131  ;;  %v130_v36 = vpop.permute.xlu0 %129 }
  0xdc   :  { %v134_v37 = vsel %vm133_vm3, %v130_v36, %v132_v35  ;;  %v135_v38 = vsel %vm133_vm3, %v132_v35, %v130_v36 }
  0xdd   :  { %v139_v41 = vmul.f32 %v998_v33, %v135_v38  ;;  %v140_v42 = vmul.f32 %v1000_v34, %v134_v37 }
  0xdf   :  { %v144_v45 = vpop.permute.xlu1 %143  ;;  %v142_v46 = vpop.permute.xlu0 %141  ;;  %v596_v47 = vpack.c.bf16 %v140_v42, %v128_v40  ;;  %v598_v48 = vpack.c.bf16 %v139_v41, %v127_v39 }
  0xe0   :  { %v146_v49 = vsel %vm145_vm4, %v142_v46, %v144_v45  ;;  %v147_v50 = vsel %vm145_vm4, %v144_v45, %v142_v46 }
  0xe1   :  { %v151_v51 = vmul.f32 %v1011_v43, %v146_v49  ;;  %v152_v52 = vmul.f32 %v1013_v44, %v147_v50  ;;  %597 = vmatprep.subr.bf16.mxu0 %v596_v47 }
  0xe2   :  { %599 = vmatpush1.bf16.msra.mxu0 %v598_v48 }
  0xe3   :  { %v156_v53 = vpop.permute.xlu1 %155  ;;  %v154_v54 = vpop.permute.xlu0 %153  ;;  %v600_v55 = vpack.c.bf16 %v152_v52, %v932_v5  ;;  %v602_v56 = vpack.c.bf16 %v151_v51, %v926_v3 }
  0xe4   :  { %v158_v59 = vsel %vm157_vm5, %v154_v54, %v156_v53  ;;  %v159_v60 = vsel %vm157_vm5, %v156_v53, %v154_v54 }
  0xe5   :  { %601 = vmatprep.subr.bf16.mxu0 %v600_v55  ;;  %v163_v3 = vmul.f32 %v1024_v57, %v158_v59  ;;  %v164_v4 = vmul.f32 %v1027_v58, %v159_v60 }
  0xe6   :  { %603 = vmatpush1.bf16.msra.mxu0 %v602_v56 }
  0xe7   :  { %v168_v63 = vpop.permute.xlu1 %167  ;;  %v166_v0 = vpop.permute.xlu0 %165 }
  0xe8   :  { %v170_v1 = vsel %vm169_vm6, %v166_v0, %v168_v63  ;;  %v171_v2 = vsel %vm169_vm6, %v168_v63, %v166_v0 }
  0xe9   :  { %v175_v5 = vmul.f32 %v1033_v61, %v170_v1  ;;  %v176_v7 = vmul.f32 %v1035_v62, %v171_v2 }
  0xeb   :  { %v180_v10 = vpop.permute.xlu1 %179  ;;  %v604_v15 = vpack.c.bf16 %v176_v7, %v164_v4  ;;  %v178_v17 = vpop.permute.xlu0 %177  ;;  %v606_v18 = vpack.c.bf16 %v175_v5, %v163_v3 }
  0xec   :  { %v182_v19 = vsel %vm181_vm7, %v178_v17, %v180_v10  ;;  %v183_v20 = vsel %vm181_vm7, %v180_v10, %v178_v17 }
  0xed   :  { %605 = vmatprep.subr.bf16.mxu0 %v604_v15  ;;  %v188_v21 = vmul.f32 %v1046_v9, %v183_v20  ;;  %v187_v22 = vmul.f32 %v1048_v16, %v182_v19 }
  0xee   :  { %607 = vmatpush1.bf16.msra.mxu0 %v606_v18 }
  0xef   :  { %211 = vmatprep.subr.mxu0 %v188_v21 }
  0xf2   :  { %212 = vmatpush1.msra.mxu0 %v187_v22 }
  0xf3   :  { %589 = vmatmul.mubr.msk.f32.vlgmr.msra.gmra.mrb[0].mxu0 %vm191_vm8, %v91_v23 }
  0xf4   :  { %557 = vmatprep.mubr.f32.mxu0 %v812_v6 }
 0x1c6   :  { %v261_v26 = vpop.f32.mrb[0].mxu0 }
 0x1c7   :  { %v262_v27 = vadd.f32 %v261_v26, %v189_v24  ;;  %v263_v28 = vpop.f32.mrb[1].mxu0 }
 0x1c8   :  { %v264_v31 = vadd.f32 %v263_v28, %v190_v25 }
 0x1c9   :  { %vm266_vm9 = vcmp.gt.f32.partialorder %v262_v27, 0.0  ;;  %v268_v32 = vmul.f32 0.01, %v262_v27 }
 0x1ca   :  { %vm267_vm10 = vcmp.gt.f32.partialorder %v264_v31, 0.0  ;;  %v269_v35 = vmul.f32 0.01, %v264_v31 }
 0x1cb   :  { %v1058_v36 = vsel %vm266_vm9, %v262_v27, %v268_v32 }
 0x1cc   :  { %v271_v37 = vsel %vm267_vm10, %v264_v31, %v269_v35  ;;  %274 = vrot.lane.b32.xlu0 %v1058_v36, %s807_s3 }
 0x1cd   :  { %276 = vrot.lane.b32.xlu1 %v271_v37, %s807_s3 }
 0x1d0   :  { %282 = vrot.lane.b32.xlu0 %v1058_v36, %s801_s15 }
 0x1d1   :  { %284 = vrot.lane.b32.xlu1 %v271_v37, %s801_s15 }
 0x1d4   :  { %290 = vrot.lane.b32.xlu0 %v1058_v36, %s808_s4 }
 0x1d5   :  { %292 = vrot.lane.b32.xlu1 %v271_v37, %s808_s4 }
 0x1d8   :  { %298 = vrot.lane.b32.xlu0 %v1058_v36, %s809_s1 }
 0x1d9   :  { %300 = vrot.lane.b32.xlu1 %v271_v37, %s809_s1 }
 0x1dc   :  { %306 = vrot.lane.b32.xlu0 %v1058_v36, %s810_s21 }
 0x1dd   :  { %308 = vrot.lane.b32.xlu1 %v271_v37, %s810_s21 }
 0x1e0   :  { %314 = vrot.lane.b32.xlu0 %v1058_v36, %s811_s30 }
 0x1e1   :  { %316 = vrot.lane.b32.xlu1 %v271_v37, %s811_s30 }
 0x1e4   :  { %322 = vrot.lane.b32.xlu0 %v1058_v36, %s813_s6 }
 0x1e5   :  { %324 = vrot.lane.b32.xlu1 %v271_v37, %s813_s6 }
 0x1e8   :  { %330 = vrot.lane.b32.xlu0 %v1058_v36, %s814_s7 }
 0x1e9   :  { %332 = vrot.lane.b32.xlu1 %v271_v37, %s814_s7 }
 0x23e   :  { %v275_v6 = vpop.permute.xlu0 %274 }
 0x23f   :  { %v277_v38 = vpop.permute.xlu1 %276 }
 0x240   :  { %v278_v39 = vsel %vm98_vm1, %v275_v6, %v277_v38  ;;  %v279_v40 = vsel %vm98_vm1, %v277_v38, %v275_v6 }
 0x241   :  { %v280_v47 = vmul.f32 %v279_v40, %v970_v12  ;;  %v281_v49 = vmul.f32 %v278_v39, %v972_v13 }
 0x242   :  { %v283_v41 = vpop.permute.xlu0 %282 }
 0x243   :  { %v285_v42 = vpop.permute.xlu1 %284 }
 0x244   :  { %v286_v45 = vsel %vm109_vm0, %v283_v41, %v285_v42  ;;  %v287_v46 = vsel %vm109_vm0, %v285_v42, %v283_v41 }
 0x245   :  { %v288_v48 = vmul.f32 %v287_v46, %v967_v11  ;;  %v289_v50 = vmul.f32 %v286_v45, %v974_v14 }
 0x246   :  { %v291_v51 = vpop.permute.xlu0 %290 }
 0x247   :  { %v293_v52 = vpop.permute.xlu1 %292  ;;  %v608_v53 = vpack.c.bf16 %v289_v50, %v281_v49  ;;  %v610_v54 = vpack.c.bf16 %v288_v48, %v280_v47  ;;  %v273_v48 = vld [vmem:[#allocation7 + $0x8] sm:$0xff]  ;;  %v340_v50 = vld [vmem:[#allocation8 + $0x18] sm:$0xff] }
 0x248   :  { %v294_v55 = vsel %vm121_vm2, %v291_v51, %v293_v52  ;;  %v295_v56 = vsel %vm121_vm2, %v293_v52, %v291_v51  ;;  %v339_v49 = vld [vmem:[#allocation8 + $0x10] sm:$0xff] }
 0x249   :  { %609 = vmatprep.subr.bf16.mxu1 %v608_v53  ;;  %v296_v1 = vmul.f32 %v295_v56, %v989_v29  ;;  %v297_v2 = vmul.f32 %v294_v55, %v992_v30 }
 0x24a   :  { %611 = vmatpush1.bf16.msra.mxu1 %v610_v54  ;;  %v299_v59 = vpop.permute.xlu0 %298 }
 0x24b   :  { %v301_v60 = vpop.permute.xlu1 %300 }
 0x24c   :  { %v302_v63 = vsel %vm133_vm3, %v299_v59, %v301_v60  ;;  %v303_v0 = vsel %vm133_vm3, %v301_v60, %v299_v59 }
 0x24d   :  { %v304_v3 = vmul.f32 %v303_v0, %v998_v33  ;;  %v305_v4 = vmul.f32 %v302_v63, %v1000_v34 }
 0x24e   :  { %v307_v5 = vpop.permute.xlu0 %306 }
 0x24f   :  { %v309_v7 = vpop.permute.xlu1 %308  ;;  %v612_v10 = vpack.c.bf16 %v305_v4, %v297_v2  ;;  %v614_v15 = vpack.c.bf16 %v304_v3, %v296_v1 }
 0x250   :  { %v310_v17 = vsel %vm145_vm4, %v307_v5, %v309_v7  ;;  %v311_v18 = vsel %vm145_vm4, %v309_v7, %v307_v5 }
 0x251   :  { %v312_v19 = vmul.f32 %v310_v17, %v1011_v43  ;;  %v313_v20 = vmul.f32 %v311_v18, %v1013_v44  ;;  %613 = vmatprep.subr.bf16.mxu1 %v612_v10 }
 0x252   :  { %615 = vmatpush1.bf16.msra.mxu1 %v614_v15  ;;  %v315_v21 = vpop.permute.xlu0 %314 }
 0x253   :  { %v317_v22 = vpop.permute.xlu1 %316  ;;  %v616_v23 = vpack.c.bf16 %v313_v20, %v271_v37  ;;  %v618_v24 = vpack.c.bf16 %v312_v19, %v1058_v36 }
 0x254   :  { %v318_v25 = vsel %vm157_vm5, %v315_v21, %v317_v22  ;;  %v319_v26 = vsel %vm157_vm5, %v317_v22, %v315_v21 }
 0x255   :  { %617 = vmatprep.subr.bf16.mxu1 %v616_v23  ;;  %v320_v35 = vmul.f32 %v318_v25, %v1024_v57  ;;  %v321_v36 = vmul.f32 %v319_v26, %v1027_v58 }
 0x256   :  { %619 = vmatpush1.bf16.msra.mxu1 %v618_v24  ;;  %v323_v27 = vpop.permute.xlu0 %322 }
 0x257   :  { %v325_v28 = vpop.permute.xlu1 %324 }
 0x258   :  { %v326_v31 = vsel %vm169_vm6, %v323_v27, %v325_v28  ;;  %v327_v32 = vsel %vm169_vm6, %v325_v28, %v323_v27 }
 0x259   :  { %v328_v37 = vmul.f32 %v326_v31, %v1033_v61  ;;  %v329_v6 = vmul.f32 %v327_v32, %v1035_v62 }
 0x25a   :  { %v331_v38 = vpop.permute.xlu0 %330 }
 0x25b   :  { %v333_v39 = vpop.permute.xlu1 %332  ;;  %v620_v40 = vpack.c.bf16 %v329_v6, %v321_v36  ;;  %v622_v41 = vpack.c.bf16 %v328_v37, %v320_v35 }
 0x25c   :  { %v335_v42 = vsel %vm181_vm7, %v333_v39, %v331_v38  ;;  %v334_v45 = vsel %vm181_vm7, %v331_v38, %v333_v39 }
 0x25d   :  { %v337_v46 = vmul.f32 %v335_v42, %v1046_v9  ;;  %621 = vmatprep.subr.bf16.mxu1 %v620_v40  ;;  %v336_v47 = vmul.f32 %v334_v45, %v1048_v16 }
 0x25e   :  { %623 = vmatpush1.bf16.msra.mxu1 %v622_v41 }
 0x25f   :  { %360 = vmatprep.subr.mxu1 %v337_v46 }
 0x262   :  { %361 = vmatpush1.msra.mxu1 %v336_v47 }
 0x263   :  { %590 = vmatmul.mubr.msk.f32.vlgmr.msra.gmra.mrb[0].mxu1 %vm191_vm8, %v273_v48 }
 0x336   :  { %v410_v51 = vpop.f32.mrb[0].mxu1 }
 0x337   :  { %v411_v52 = vadd.f32 %v410_v51, %v339_v49  ;;  %v412_v53 = vpop.f32.mrb[1].mxu1 }
 0x338   :  { %v413_v54 = vadd.f32 %v412_v53, %v340_v50 }
 0x339   :  { %vm415_vm11 = vcmp.gt.f32.partialorder %v411_v52, 0.0  ;;  %v417_v55 = vmul.f32 0.01, %v411_v52 }
 0x33a   :  { %vm416_vm12 = vcmp.gt.f32.partialorder %v413_v54, 0.0  ;;  %v418_v56 = vmul.f32 0.01, %v413_v54 }
 0x33b   :  { %v1134_v59 = vsel %vm415_vm11, %v411_v52, %v417_v55 }
 0x33c   :  { %v420_v60 = vsel %vm416_vm12, %v413_v54, %v418_v56  ;;  %423 = vrot.lane.b32.xlu0 %v1134_v59, %s807_s3 }
 0x33d   :  { %425 = vrot.lane.b32.xlu1 %v420_v60, %s807_s3 }
 0x340   :  { %431 = vrot.lane.b32.xlu0 %v1134_v59, %s801_s15 }
 0x341   :  { %433 = vrot.lane.b32.xlu1 %v420_v60, %s801_s15  ;;  %s815_s15 = smov [#allocation11]  }
 0x342   :  { %s578_s8 = sshll.u32 %s815_s15, 4  ;;  %s579_s8 = int_to_ptr.vmem [resolvable:$true] %s578_s8 }
 0x343   :  { %s768_s9 = scalar_lea.vmem %s579_s8, 256  ;;  %p773_p13 = scmp.lt.s32.totalorder %s579_s8, %s579_s8 }
 0x344   :  { %439 = vrot.lane.b32.xlu0 %v1134_v59, %s808_s4  ;;  %p769_p12 = scmp.ne.s32.totalorder %s579_s8, %s768_s9  ;;  %p774_p0 = scmp.lt.s32.totalorder %s768_s9, %s768_s9 }
 0x345   :  { %441 = vrot.lane.b32.xlu1 %v420_v60, %s808_s4 }
 0x346   :  { %p775_p1 = por %p774_p0, %p773_p13 }
 0x348   :  { %447 = vrot.lane.b32.xlu0 %v1134_v59, %s809_s1  ;;  %p776_p2 = pnand %p775_p1, %p769_p12 }
 0x349   :  { %449 = vrot.lane.b32.xlu1 %v420_v60, %s809_s1 }
 0x34c   :  { %455 = vrot.lane.b32.xlu0 %v1134_v59, %s810_s21 }
 0x34d   :  { %457 = vrot.lane.b32.xlu1 %v420_v60, %s810_s21 }
 0x350   :  { %463 = vrot.lane.b32.xlu0 %v1134_v59, %s811_s30 }
 0x351   :  { %465 = vrot.lane.b32.xlu1 %v420_v60, %s811_s30 }
 0x354   :  { %471 = vrot.lane.b32.xlu0 %v1134_v59, %s813_s6 }
 0x355   :  { %473 = vrot.lane.b32.xlu1 %v420_v60, %s813_s6 }
 0x358   :  { %479 = vrot.lane.b32.xlu0 %v1134_v59, %s814_s7 }
 0x359   :  { %481 = vrot.lane.b32.xlu1 %v420_v60, %s814_s7 }
 0x3ae   :  { %v424_v63 = vpop.permute.xlu0 %423 }
 0x3af   :  { %v426_v0 = vpop.permute.xlu1 %425 }
 0x3b0   :  { %v427_v1 = vsel %vm98_vm1, %v424_v63, %v426_v0  ;;  %v428_v2 = vsel %vm98_vm1, %v426_v0, %v424_v63 }
 0x3b1   :  { %v429_v10 = vmul.f32 %v428_v2, %v970_v12  ;;  %v430_v15 = vmul.f32 %v427_v1, %v972_v13 }
 0x3b2   :  { %v432_v3 = vpop.permute.xlu0 %431 }
 0x3b3   :  { %v434_v4 = vpop.permute.xlu1 %433 }
 0x3b4   :  { %v435_v5 = vsel %vm109_vm0, %v432_v3, %v434_v4  ;;  %v436_v7 = vsel %vm109_vm0, %v434_v4, %v432_v3 }
 0x3b5   :  { %v437_v17 = vmul.f32 %v436_v7, %v967_v11  ;;  %v438_v18 = vmul.f32 %v435_v5, %v974_v14 }
 0x3b6   :  { %v440_v19 = vpop.permute.xlu0 %439 }
 0x3b7   :  { %v626_v20 = vpack.c.bf16 %v437_v17, %v429_v10  ;;  %v442_v21 = vpop.permute.xlu1 %441  ;;  %v624_v22 = vpack.c.bf16 %v438_v18, %v430_v15 }
 0x3b8   :  { %v443_v23 = vsel %vm121_vm2, %v440_v19, %v442_v21  ;;  %v444_v24 = vsel %vm121_vm2, %v442_v21, %v440_v19 }
 0x3b9   :  { %625 = vmatprep.subr.bf16.mxu0 %v624_v22  ;;  %v445_v14 = vmul.f32 %v444_v24, %v989_v29  ;;  %v446_v26 = vmul.f32 %v443_v23, %v992_v30 }
 0x3ba   :  { %627 = vmatpush1.bf16.msra.mxu0 %v626_v20  ;;  %v448_v25 = vpop.permute.xlu0 %447 }
 0x3bb   :  { %v450_v12 = vpop.permute.xlu1 %449 }
 0x3bc   :  { %v451_v13 = vsel %vm133_vm3, %v448_v25, %v450_v12  ;;  %v452_v11 = vsel %vm133_vm3, %v450_v12, %v448_v25 }
 0x3bd   :  { %v453_v27 = vmul.f32 %v452_v11, %v998_v33  ;;  %v454_v28 = vmul.f32 %v451_v13, %v1000_v34 }
 0x3be   :  { %v456_v31 = vpop.permute.xlu0 %455 }
 0x3bf   :  { %v630_v32 = vpack.c.bf16 %v453_v27, %v445_v14  ;;  %v458_v35 = vpop.permute.xlu1 %457  ;;  %v628_v36 = vpack.c.bf16 %v454_v28, %v446_v26 }
 0x3c0   :  { %v459_v37 = vsel %vm145_vm4, %v456_v31, %v458_v35  ;;  %v460_v6 = vsel %vm145_vm4, %v458_v35, %v456_v31 }
 0x3c1   :  { %v461_v38 = vmul.f32 %v459_v37, %v1011_v43  ;;  %v462_v29 = vmul.f32 %v460_v6, %v1013_v44  ;;  %629 = vmatprep.subr.bf16.mxu0 %v628_v36 }
 0x3c2   :  { %631 = vmatpush1.bf16.msra.mxu0 %v630_v32  ;;  %v464_v30 = vpop.permute.xlu0 %463 }
 0x3c3   :  { %v634_v33 = vpack.c.bf16 %v461_v38, %v1134_v59  ;;  %v466_v34 = vpop.permute.xlu1 %465  ;;  %v632_v39 = vpack.c.bf16 %v462_v29, %v420_v60 }
 0x3c4   :  { %v467_v40 = vsel %vm157_vm5, %v464_v30, %v466_v34  ;;  %v468_v41 = vsel %vm157_vm5, %v466_v34, %v464_v30 }
 0x3c5   :  { %633 = vmatprep.subr.bf16.mxu0 %v632_v39  ;;  %v469_v46 = vmul.f32 %v467_v40, %v1024_v57  ;;  %v470_v47 = vmul.f32 %v468_v41, %v1027_v58  ;;  %v422_v58 = vld [vmem:[#allocation7 + $0x10] sm:$0xff] }
 0x3c6   :  { %635 = vmatpush1.bf16.msra.mxu0 %v634_v33  ;;  %v472_v42 = vpop.permute.xlu0 %471 }
 0x3c7   :  { %v474_v45 = vpop.permute.xlu1 %473 }
 0x3c8   :  { %v475_v43 = vsel %vm169_vm6, %v472_v42, %v474_v45  ;;  %v476_v44 = vsel %vm169_vm6, %v474_v45, %v472_v42 }
 0x3c9   :  { %v477_v48 = vmul.f32 %v475_v43, %v1033_v61  ;;  %v478_v49 = vmul.f32 %v476_v44, %v1035_v62  ;;  %v488_v61 = vld [vmem:[#allocation8 + $0x20] sm:$0xff]  ;;  %v489_v62 = vld [vmem:[#allocation8 + $0x28] sm:$0xff] }
 0x3ca   :  { %v480_v50 = vpop.permute.xlu0 %479 }
 0x3cb   :  { %v638_v51 = vpack.c.bf16 %v477_v48, %v469_v46  ;;  %v482_v52 = vpop.permute.xlu1 %481  ;;  %v636_v53 = vpack.c.bf16 %v478_v49, %v470_v47 }
 0x3cc   :  { %v484_v54 = vsel %vm181_vm7, %v482_v52, %v480_v50  ;;  %v483_v55 = vsel %vm181_vm7, %v480_v50, %v482_v52 }
 0x3cd   :  { %v486_v56 = vmul.f32 %v484_v54, %v1046_v9  ;;  %637 = vmatprep.subr.bf16.mxu0 %v636_v53  ;;  %v485_v57 = vmul.f32 %v483_v55, %v1048_v16 }
 0x3ce   :  { %639 = vmatpush1.bf16.msra.mxu0 %v638_v51 }
 0x3cf   :  { %509 = vmatprep.subr.mxu0 %v486_v56 }
 0x3d2   :  { %510 = vmatpush1.msra.mxu0 %v485_v57 }
 0x3d3   :  { %591 = vmatmul.mubr.msk.f32.vlgmr.msra.gmra.mrb[2].mxu0 %vm191_vm8, %v422_v58 }
 0x4a6   :  { %v559_v59 = vpop.f32.mrb[2].mxu0 }
 0x4a7   :  { %v560_v60 = vadd.f32 %v559_v59, %v488_v61  ;;  %v561_v63 = vpop.f32.mrb[3].mxu0 }
 0x4a8   :  { %v562_v0 = vadd.f32 %v561_v63, %v489_v62 }
 0x4a9   :  { %vm564_vm13 = vcmp.gt.f32.partialorder %v560_v60, 0.0  ;;  %v566_v8 = vmul.f32 0.01, %v560_v60 }
 0x4aa   :  { %vm565_vm14 = vcmp.gt.f32.partialorder %v562_v0, 0.0  ;;  %v567_v9 = vmul.f32 0.01, %v562_v0 }
 0x4ab   :  { %v568_v1 = vsel %vm564_vm13, %v560_v60, %v566_v8 }
 0x4ac   :  { %v569_v2 = vsel %vm565_vm14, %v562_v0, %v567_v9  ;;  %570 = vst [vmem:[#allocation11] sm:$0xff] %v568_v1 }
 0x4ad   :  { %571 = vst [vmem:[#allocation11 + $0x8] sm:$0xff] %v569_v2 }
 0x4ae   :  { %779 = shalt.err (!%p776_p2)
}
 0x4af   :  { %s780_s12 = scalar_lea.hbm %s1227_s5, 256 }
 0x4b0   :  { %p781_p3 = scmp.ne.s32.totalorder %s1227_s5, %s780_s12  ;;  %p784_p4 = scmp.lt.u32.totalorder %s780_s12, %s1227_s5 }
 0x4b2   :  { %p786_p5 = pnand %p784_p4, %p781_p3 }
 0x4b4   :  { %789 = shalt.err (!%p786_p5)
}
 0x4b5   :  { %581 = dma.vmem_to_hbm [thread:$0]  %s579_s8, 256, %s1227_s5, [#allocation4]  }
 0x4b6   :  { %796 = dma.done.wait [#allocation4], 256  }
 0x4b7   :  { %797 = vsyncadd [#allocation4], 4294967040 }
 0x4b8   :  { %585 = vsyncpa [#allocation3], 1 }
 0x4b9   :  { %586 = vsyncpa [#allocation6], 1 }
 0x4ba   :  { %587 = vsyncpa [#allocation9], 1 }
 0x4bb   :  { %588 = vsyncpa [#allocation4], 1 }

</bundles_post_ra>
